<compile_context>
chip_gen: v6e
topology: v6e:2x2x1
jax: 0.10.0
libtpu: 0.0.40
codegen_flags: <defaults>
</compile_context>

<pallas_src>
import functools

import jax
import jax.numpy as jnp
from jax.experimental import pallas as pl
from jax.experimental.pallas import tpu as pltpu


_LANE = 128
_MAX_COLS = 1024        # lane-dense slab width candidate (multiple of 128)
_ROW_ALIGN = 32         # sublane-pack-safe for f32 (8), bf16 (16), int8 (32)


def _cdiv(a, b):
    return -(-a // b)


def _round_up(n, m):
    return ((n + m - 1) // m) * m


def _lambda_kernel(x_ref, o_ref, *, lambd):
    # Elementwise hot path: VPU/EUP over one lane-dense VMEM tile.
    o_ref[...] = lambd(x_ref[...]).astype(o_ref.dtype)


def _signed_sqrt(v):
    # Signed-sqrt normalization used after bilinear pooling.
    # copysign formulation: sqrt goes to the EUP slot, sign transfer is a
    # cheap bit op (no compare/select/mul chain).
    return jnp.copysign(jnp.sqrt(jnp.abs(v)), v)


@functools.lru_cache(maxsize=1)
def _generation_tuning():
    """Per-generation (tile_bytes, vmem_limit_bytes, target_min_grid_steps)."""
    kind = ""
    try:
        kind = jax.devices()[0].device_kind.lower()
    except Exception:  # pragma: no cover - CPU/interpret fallback
        pass
    if "v7" in kind:
        # ~3.2 TB/s HBM: 8 MiB tiles keep the ~0.35us/step overhead <5%.
        # 2x(in+out) double-buffered 8 MiB tiles = 32 MiB; set the scoped-VMEM
        # limit to 40 MiB (physical 64 MiB) leaving Mosaic scratch headroom.
        # Megacore shards the grid: aim for >=8 steps so each core gets >=4.
        return 8 << 20, 40 << 20, 8
    if "v6" in kind:
        # ~1.4 TB/s HBM: 4 MiB tiles (16 MiB double-buffered, inside the
        # 32 MiB scoped default / 128 MiB physical VMEM).
        return 4 << 20, None, 4
    # v5e / unknown: 16 MiB scoped default leaves no headroom above 2 MiB
    # double-buffered tiles, and at ~0.82 TB/s per-step overhead is already <7%.
    return 2 << 20, None, 4


class PallasLambda:
    """Pallas equivalent of torch `Lambda(lambd)` for elementwise lambdas."""

    def __init__(self, lambd, min_pallas_elems=4 * 1024 * 1024,
                 donate_input=False):
        self.lambd = lambd
        # Below this size XLA's fused elementwise already hits the HBM
        # roofline for a standalone op; Pallas launch + pipeline ramp-up would
        # just add overhead.
        self.min_pallas_elems = min_pallas_elems
        # Alias the output HBM buffer onto the (reshaped) input when no
        # padding is needed.  UNSAFE if the caller still needs x afterwards,
        # so it is opt-in.
        self.donate_input = donate_input
        # jit the whole forward: reshapes/slices become metadata ops and
        # dispatch overhead disappears; retraces per (shape, dtype).
        self._forward = jax.jit(self._forward_impl)

    def __call__(self, x):
        return self._forward(x)

    def _forward_impl(self, x):
        total = x.size
        if total == 0 or total < self.min_pallas_elems:
            return self.lambd(x).astype(x.dtype)

        tile_bytes, vmem_limit, min_steps = _generation_tuning()
        itemsize = jnp.dtype(x.dtype).itemsize

        # ---- lane-dense 2D slab (rows, cols), cols % 128 == 0 ---------------
        # Largest multiple of 128 (<= _MAX_COLS) dividing `total` -> zero-copy
        # flatten (no pad pass over HBM).  NN activation sizes almost always
        # divide evenly; the fallback pads only a <128-element tail.
        cols = None
        for c in range(_MAX_COLS, _LANE - 1, -_LANE):
            if total % c == 0:
                cols = c
                break
        if cols is None:
            cols = _LANE
        rows = _cdiv(total, cols)
        pad = rows * cols - total

        flat = jnp.ravel(x)
        if pad:
            # Padded tail is trimmed below and never written back; a generic
            # lambd may produce Inf/NaN there (e.g. log, 1/x) -- harmless, but
            # do not add reductions over the untrimmed buffer.
            flat = jnp.pad(flat, (0, pad))
        x2d = flat.reshape(rows, cols)

        # ---- balanced row tiling (no row padding) ----------------------------
        max_tile_rows = max(_ROW_ALIGN, tile_bytes // (cols * itemsize))
        if rows <= _ROW_ALIGN:
            # Single block equal to the full array (always layout-legal).
            tile_rows, num_tiles = rows, 1
        else:
            # Enough tiles for the per-generation VMEM cap, and aim for
            # `min_steps` grid steps so the DMA pipeline (and v7x megacore)
            # stay busy -- but never shrink below the sublane quantum.  The
            # final block may be partial; Pallas clips it, so no row-pad pass.
            num_tiles = max(_cdiv(rows, max_tile_rows),
                            min(min_steps, _cdiv(rows, _ROW_ALIGN)))
            if num_tiles == 1:
                tile_rows = rows
            else:
                tile_rows = _round_up(_cdiv(rows, num_tiles), _ROW_ALIGN)
                num_tiles = _cdiv(rows, tile_rows)

        kernel = functools.partial(_lambda_kernel, lambd=self.lambd)
        alias = {0: 0} if (self.donate_input and pad == 0) else {}
        out2d = pl.pallas_call(
            kernel,
            out_shape=jax.ShapeDtypeStruct((rows, cols), x.dtype),
            grid=(num_tiles,),
            in_specs=[pl.BlockSpec((tile_rows, cols), lambda i: (i, 0))],
            out_specs=pl.BlockSpec((tile_rows, cols), lambda i: (i, 0)),
            compiler_params=pltpu.CompilerParams(
                # Independent elementwise tiles: shard across TensorCores
                # (v7x megacore) and keep default double buffering.
                dimension_semantics=("parallel",),
                vmem_limit_bytes=vmem_limit,
            ),
            input_output_aliases=alias,
        )(x2d)

        out = out2d.reshape(-1)
        if pad:
            out = out[:total]
        return out.reshape(x.shape)


if __name__ == "__main__":
    key = jax.random.PRNGKey(0)
    k0, k1 = jax.random.split(key)

    lambd = _signed_sqrt

    # Spec-consistent small NCHW input (batch=2, channels=4, spatial=16x16).
    # Force the Pallas path (the default threshold would take the plain-JAX
    # fast path at this size) so the kernel itself is exercised.
    x_small = jax.random.normal(k0, (2, 4, 16, 16), dtype=jnp.float32)
    module_forced = PallasLambda(lambd, min_pallas_elems=0)
    out_small = jax.block_until_ready(module_forced(x_small))
    ref_small = lambd(x_small)
    assert out_small.shape == x_small.shape and out_small.dtype == x_small.dtype
    assert jnp.allclose(out_small, ref_small, atol=1e-6, rtol=1e-6)

    # Medium activation-sized input exercising the multi-tile pipelined path
    # (balanced row tiles, >=4 grid steps on every generation).
    x_big = jax.random.normal(k1, (2, 128, 64, 64), dtype=jnp.float32)
    out_big = jax.block_until_ready(module_forced(x_big))
    ref_big = lambd(x_big)
    assert out_big.shape == x_big.shape and out_big.dtype == x_big.dtype
    assert jnp.allclose(out_big, ref_big, atol=1e-6, rtol=1e-6)

    # Default-threshold module: medium tensor takes the plain-JAX fast path
    # (XLA fused elementwise already at the HBM roofline for standalone ops).
    module_default = PallasLambda(lambd)
    out_fast = jax.block_until_ready(module_default(x_big))
    assert jnp.allclose(out_fast, ref_big, atol=1e-6, rtol=1e-6)

    print("KERNEL_OK")
</pallas_src>

<mosaic_0001>
module attributes {stable_mosaic.version = 11 : i64} {
  func.func @_lambda_kernel(%arg0: i32, %arg1: memref<2x1024xf32, #tpu.memory_space<vmem>>, %arg2: memref<2x1024xf32, #tpu.memory_space<vmem>>) attributes {dimension_semantics = [#tpu.dimension_semantics<parallel>], iteration_bounds = array<i64: 1>, scalar_prefetch = 0 : i64, scratch_operands = 0 : i64, tpu.core_type = #tpu.core_type<tc>, window_params = [{transform_indices = @transform_0, window_bounds = array<i64: 2, 1024>}, {transform_indices = @transform_1, window_bounds = array<i64: 2, 1024>}]} {
    %c0 = arith.constant 0 : index
    %c0_0 = arith.constant 0 : index
    %0 = vector.load %arg1[%c0, %c0_0] : memref<2x1024xf32, #tpu.memory_space<vmem>>, vector<2x1024xf32>
    %1 = math.absf %0 : vector<2x1024xf32>
    %2 = math.sqrt %1 : vector<2x1024xf32>
    %3 = tpu.bitcast %0 : vector<2x1024xf32> -> vector<2x1024xi32>
    %c31_i32 = arith.constant 31 : i32
    %4 = vector.broadcast %c31_i32 : i32 to vector<2x1024xi32>
    %5 = arith.shrsi %3, %4 : vector<2x1024xi32>
    %c0_i32 = arith.constant 0 : i32
    %6 = vector.broadcast %c0_i32 : i32 to vector<2x1024xi32>
    %7 = arith.cmpi ne, %5, %6 : vector<2x1024xi32>
    %8 = math.absf %2 : vector<2x1024xf32>
    %cst = arith.constant 0.000000e+00 : f32
    %9 = vector.broadcast %cst : f32 to vector<2x1024xf32>
    %10 = arith.subf %9, %8 : vector<2x1024xf32>
    %11 = math.absf %2 : vector<2x1024xf32>
    %12 = arith.select %7, %10, %11 : vector<2x1024xi1>, vector<2x1024xf32>
    %c0_1 = arith.constant 0 : index
    %c0_2 = arith.constant 0 : index
    %13 = vector.load %arg2[%c0_1, %c0_2] : memref<2x1024xf32, #tpu.memory_space<vmem>>, vector<2x1024xf32>
    tpu.vector_store %arg2[%c0_1, %c0_2], %12 {strides = array<i32>} : memref<2x1024xf32, #tpu.memory_space<vmem>>, vector<2x1024xf32>,
    return
  }
  func.func @transform_0(%arg0: i32) -> (i32, i32) {
    %c0_i32 = arith.constant 0 : i32
    %c0_i32_0 = arith.constant 0 : i32
    return %arg0, %c0_i32 : i32, i32
  }
  func.func @transform_1(%arg0: i32) -> (i32, i32) {
    %c0_i32 = arith.constant 0 : i32
    %c0_i32_0 = arith.constant 0 : i32
    return %arg0, %c0_i32 : i32, i32
  }
}

</mosaic_0001>

<bundles_post_ra>
// kernel: _forward_impl.1
= control target key start
LH: loop header
LB: loop body
LE: loop exit
PB: predicated region body
PF: predicated region fallthrough
CT: control target
= control target key end

     0   :  { %v32_v0 = vlaneseq  ;;  %v235_v2 = vmov 1983009808   ;;  %s307_s0 = inlined_call_operand.vmem [shape: f32[2,1024], index: 0, kind: input, shape index: {}]   ;;  %s308_s1 = inlined_call_operand.vmem [shape: f32[2,1024], index: 1, kind: output, shape index: {}]  }
   0x1   :  { %v8_v1 = vld [vmem:[%s307_s0] sm:$0xff]  ;;  %v30_v3 = vunpack.c.l.s4 %v235_v2  ;;  %v9_v4 = vld [vmem:[%s307_s0 + $0x8] sm:$0xff] }
   0x2   :  { %v10_v5 = vand.u32 2147483647, %v8_v1  ;;  %v11_v6 = vand.u32 2147483647, %v9_v4  ;;  %v33_v8 = vshrl.u32 %v32_v0, 7  ;;  %v28_v10 = vcombine.high %v8_v1, %v8_v1 }
   0x3   :  { %v31_v7 = vunpack.c.0.s8 %v30_v3  ;;  %v45_v11 = vcombine.high %v9_v4, %v9_v4 }
   0x4   :  { %231 = vrsqrt.f32 %v10_v5  ;;  %vm14_vm0 = vcmp.eq.f32.partialorder %v10_v5, inf  ;;  %vm16_vm1 = vcmp.eq.f32.partialorder %v10_v5, 0.0  ;;  %v17_v17 = vand.u32 2147483648, %v10_v5 }
   0x5   :  { %233 = vrsqrt.f32 %v11_v6  ;;  %v252_v9 = vsub.s32 %v31_v7, %v33_v8  ;;  %vm21_vm2 = vcmp.eq.f32.partialorder %v11_v6, inf  ;;  %vm23_vm3 = vcmp.eq.f32.partialorder %v11_v6, 0.0 }
   0x6   :  { %v24_v25 = vand.u32 2147483648, %v11_v6 }
   0x7   :  { %v35_v12 = vrot.slane %v8_v1, %v252_v9  ;;  %v42_v13 = vrot.slane %v28_v10, %v252_v9  ;;  %v52_v14 = vrot.slane %v9_v4, %v252_v9  ;;  %v59_v15 = vrot.slane %v45_v11, %v252_v9 }
   0x9   :  { %v43_v16 = vcombine.high %v35_v12, %v35_v12  ;;  %v44_v18 = vcombine.high %v42_v13, %v42_v13  ;;  %v62_v20 = vshra.s32 %v35_v12, 31  ;;  %v60_v21 = vcombine.high %v52_v14, %v52_v14 }
   0xa   :  { %v64_v24 = vshra.s32 %v42_v13, 31  ;;  %v61_v26 = vcombine.high %v59_v15, %v59_v15  ;;  %v66_v29 = vshra.s32 %v52_v14, 31  ;;  %v68_v30 = vshra.s32 %v59_v15, 31 }
   0xb   :  { %v63_v27 = vshra.s32 %v43_v16, 31  ;;  %v65_v32 = vshra.s32 %v44_v18, 31  ;;  %vm260_vm4 = vcmp.ne.s32.totalorder %v62_v20, 0  ;;  %v67_v36 = vshra.s32 %v60_v21, 31 }
   0xc   :  { %vm265_vm5 = vcmp.ne.s32.totalorder %v64_v24, 0  ;;  %v69_v40 = vshra.s32 %v61_v26, 31  ;;  %vm270_vm7 = vcmp.ne.s32.totalorder %v66_v29, 0  ;;  %vm274_vm8 = vcmp.ne.s32.totalorder %v68_v30, 0 }
   0xd   :  { %vm71_vm6 = vcmp.ne.s32.totalorder %v63_v27, 0  ;;  %vm73_vm9 = vcmp.ne.s32.totalorder %v65_v32, 0  ;;  %vm75_vm10 = vcmp.ne.s32.totalorder %v67_v36, 0 }
   0xe   :  { %vm77_vm11 = vcmp.ne.s32.totalorder %v69_v40, 0 }
  0x11   :  { %v232_v19 = vpop.eup %231 }
  0x12   :  { %v234_v22 = vpop.eup %233  ;;  %v13_v23 = vmul.f32 %v232_v19, %v10_v5 }
  0x13   :  { %v20_v28 = vmul.f32 %v234_v22, %v11_v6 }
  0x14   :  { %v15_v31 = vsel %vm14_vm0, %v10_v5, %v13_v23 }
  0x15   :  { %v18_v33 = vsel %vm16_vm1, %v17_v17, %v15_v31  ;;  %v22_v35 = vsel %vm21_vm2, %v11_v6, %v20_v28 }
  0x16   :  { %v78_v38 = vand.u32 2147483647, %v18_v33  ;;  %v25_v39 = vsel %vm23_vm3, %v24_v25, %v22_v35 }
  0x17   :  { %v79_v43 = vand.u32 2147483647, %v25_v39 }
  0x18   :  { %v80_v44 = vsub.f32 0.0, %v78_v38  ;;  %v128_v45 = vcombine.high %v78_v38, %v78_v38  ;;  %v135_v46 = vrot.slane %v78_v38, %v252_v9 }
  0x19   :  { %v81_v47 = vsub.f32 0.0, %v79_v43  ;;  %v145_v48 = vcombine.high %v79_v43, %v79_v43  ;;  %v152_v49 = vrot.slane %v79_v43, %v252_v9 }
  0x1a   :  { %v84_v50 = vcombine.high %v80_v44, %v80_v44  ;;  %v91_v51 = vrot.slane %v80_v44, %v252_v9  ;;  %v142_v52 = vrot.slane %v128_v45, %v252_v9  ;;  %v143_v53 = vcombine.high %v135_v46, %v135_v46 }
  0x1b   :  { %v101_v54 = vcombine.high %v81_v47, %v81_v47  ;;  %v108_v55 = vrot.slane %v81_v47, %v252_v9  ;;  %v159_v56 = vrot.slane %v145_v48, %v252_v9  ;;  %v160_v57 = vcombine.high %v152_v49, %v152_v49 }
  0x1c   :  { %v98_v58 = vrot.slane %v84_v50, %v252_v9  ;;  %v99_v59 = vcombine.high %v91_v51, %v91_v51  ;;  %v144_v60 = vcombine.high %v142_v52, %v142_v52  ;;  %v170_v61 = vsel %vm260_vm4, %v91_v51, %v135_v46 }
  0x1d   :  { %v115_v62 = vrot.slane %v101_v54, %v252_v9  ;;  %v116_v63 = vcombine.high %v108_v55, %v108_v55  ;;  %v161_v0 = vcombine.high %v159_v56, %v159_v56  ;;  %v174_v1 = vsel %vm270_vm7, %v108_v55, %v152_v49 }
  0x1e   :  { %v100_v2 = vcombine.high %v98_v58, %v98_v58  ;;  %v171_v3 = vsel %vm71_vm6, %v99_v59, %v143_v53  ;;  %v172_v4 = vsel %vm265_vm5, %v98_v58, %v142_v52 }
  0x1f   :  { %v186_v5 = vcombine.low %v170_v61, %v171_v3  ;;  %v117_v6 = vcombine.high %v115_v62, %v115_v62  ;;  %v175_v7 = vsel %vm75_vm10, %v116_v63, %v160_v57  ;;  %v176_v8 = vsel %vm274_vm8, %v115_v62, %v159_v56 }
  0x20   :  { %v173_v10 = vsel %vm73_vm9, %v100_v2, %v144_v60  ;;  %v203_v11 = vcombine.low %v174_v1, %v175_v7 }
  0x21   :  { %v187_v12 = vcombine.low %v172_v4, %v173_v10  ;;  %v194_v13 = vrot.slane %v186_v5, %v252_v9  ;;  %v177_v14 = vsel %vm77_vm11, %v117_v6, %v161_v0 }
  0x22   :  { %v204_v15 = vcombine.low %v176_v8, %v177_v14  ;;  %v211_v16 = vrot.slane %v203_v11, %v252_v9 }
  0x23   :  { %v201_v17 = vrot.slane %v187_v12, %v252_v9 }
  0x24   :  { %v218_v18 = vrot.slane %v204_v15, %v252_v9 }
  0x25   :  { %v202_v19 = vcombine.low %v194_v13, %v201_v17 }
  0x26   :  { %v219_v20 = vcombine.low %v211_v16, %v218_v18 }
  0x27   :  { %222 = vst [vmem:[%s308_s1] sm:$0xff] %v202_v19 }
  0x28   :  { %223 = vst [vmem:[%s308_s1 + $0x8] sm:$0xff] %v219_v20 }

</bundles_post_ra>
